<compile_context>
chip_gen: v6e
topology: v6e:2x2x1
jax: 0.10.0
libtpu: 0.0.40
codegen_flags: <defaults>
</compile_context>

<pallas_src>
import functools

import jax
import jax.numpy as jnp
from jax import lax
from jax.experimental import pallas as pl
from jax.experimental.pallas import tpu as pltpu

EPS = 1e-5
# Scoped-VMEM cap: below v7x's 64 MiB physical with headroom, above the 32 MiB
# default so bigger production tiles are allowed on v5e/v6e.
VMEM_LIMIT = 48 * 1024 * 1024


# --------------------------- in-kernel helpers ------------------------------
def _init_stats(s_ref, q_ref):
    @pl.when(pl.program_id(0) == 0)
    def _():
        s_ref[...] = jnp.zeros_like(s_ref)
        q_ref[...] = jnp.zeros_like(q_ref)


def _emit_stats(y, y_ref, s_ref, q_ref):
    # XLU cross-lane reduces (review: keep BN sums off the MXU).
    y_ref[...] = y
    s_ref[...] += jnp.sum(y, axis=1, keepdims=True)
    q_ref[...] += jnp.sum(y * y, axis=1, keepdims=True)


def _boundary_masks(mask_ref):
    # (1, TM) booleans; broadcast over channel sublanes at use sites.
    return (mask_ref[0:1, :] > 0.5,   # i >= 1        (dy = -1 valid)
            mask_ref[1:2, :] > 0.5,   # i <= Ho - 2   (dy = +1 valid)
            mask_ref[2:3, :] > 0.5,   # j >= 1        (dx = -1 valid)
            mask_ref[3:4, :] > 0.5)   # j <= Wo - 2   (dx = +1 valid)


def _bn_affine(s_ref, q_ref, g_ref, be_ref, inv_m):
    mean = s_ref[...] * inv_m                         # (C, 1)
    var = q_ref[...] * inv_m - mean * mean            # biased var (training BN)
    scale = lax.rsqrt(var + EPS) * g_ref[...]         # EUP
    shift = be_ref[...] - mean * scale
    return scale, shift


def _conv3x3_same(act_f32, w_ref, Wo, masks, fuse_below, mxu_dtype):
    """3x3 stride-1 pad-1 conv on a (C, TM) block via roll+mask taps.

    act_f32: (C, TM) f32; w_ref: (Cout, 9*C) bf16/f32, columns tap-major.
    Correctness relies on TM being a multiple of Ho*Wo (image-aligned block).
    """
    C, TM = act_f32.shape
    m_top, m_bot, m_left, m_right = masks
    taps = []
    for dy in (-1, 0, 1):
        for dx in (-1, 0, 1):
            s = dy * Wo + dx
            tap = act_f32 if s == 0 else pltpu.roll(act_f32, shift=(-s) % TM, axis=1)
            conds = []
            if dy == -1:
                conds.append(m_top)
            elif dy == 1:
                conds.append(m_bot)
            if dx == -1:
                conds.append(m_left)
            elif dx == 1:
                conds.append(m_right)
            if conds:
                m = conds[0] if len(conds) == 1 else jnp.logical_and(conds[0], conds[1])
                tap = jnp.where(m, tap, 0.0)          # masking stays in f32 (v5e)
            taps.append(tap)

    if C < fuse_below:
        # Toy channel counts: one K=9*C matmul (no VMEM scratch slab, just a
        # register/VMEM temporary the compiler manages).
        slab = jnp.concatenate(taps, axis=0).astype(mxu_dtype)        # (9C, TM)
        return jnp.dot(w_ref[...], slab, preferred_element_type=jnp.float32)

    # Production channel counts: per-tap accumulation, no 9x slab at all.
    acc = None
    for t, tap in enumerate(taps):
        part = jnp.dot(w_ref[:, t * C:(t + 1) * C], tap.astype(mxu_dtype),
                       preferred_element_type=jnp.float32)
        acc = part if acc is None else acc + part
    return acc


# ------------------------------- kernels ------------------------------------
def _make_k1(stride2, Wo, fuse_below, mxu_dtype):
    if stride2:
        # Downsample config: conv1 input is the wrapper-built im2col patch slab.
        def kernel(p1_ref, w1_ref, y1_ref, s_ref, q_ref):
            _init_stats(s_ref, q_ref)
            act = jnp.maximum(p1_ref[...], 0.0).astype(mxu_dtype)     # (9Cin, TM)
            y1 = jnp.dot(w1_ref[...], act, preferred_element_type=jnp.float32)
            _emit_stats(y1, y1_ref, s_ref, q_ref)
    else:
        # Stride-1 config: in-kernel taps, ReLU applied once to (Cin, TM).
        def kernel(x_ref, mask_ref, w1_ref, y1_ref, s_ref, q_ref):
            _init_stats(s_ref, q_ref)
            act = jnp.maximum(x_ref[...], 0.0)                        # f32
            masks = _boundary_masks(mask_ref)
            y1 = _conv3x3_same(act, w1_ref, Wo, masks, fuse_below, mxu_dtype)
            _emit_stats(y1, y1_ref, s_ref, q_ref)
    return kernel


def _make_k2(Wo, inv_m, fuse_below, mxu_dtype):
    def kernel(y1_ref, mask_ref, w2_ref, s1_ref, q1_ref, g1_ref, be1_ref,
               y2_ref, s_ref, q_ref):
        _init_stats(s_ref, q_ref)
        scale, shift = _bn_affine(s1_ref, q1_ref, g1_ref, be1_ref, inv_m)
        r1 = jnp.maximum(y1_ref[...] * scale + shift, 0.0)            # BN1 + ReLU, f32
        masks = _boundary_masks(mask_ref)
        y2 = _conv3x3_same(r1, w2_ref, Wo, masks, fuse_below, mxu_dtype)
        _emit_stats(y2, y2_ref, s_ref, q_ref)
    return kernel


def _make_k3(has_sc_conv, inv_m, mxu_dtype):
    if has_sc_conv:
        def kernel(y2_ref, xsc_ref, s2_ref, q2_ref, g2_ref, be2_ref,
                   ws_ref, bs_ref, out_ref):
            scale, shift = _bn_affine(s2_ref, q2_ref, g2_ref, be2_ref, inv_m)
            sc = jnp.dot(ws_ref[...], xsc_ref[...].astype(mxu_dtype),
                         preferred_element_type=jnp.float32) + bs_ref[...]
            out_ref[...] = y2_ref[...] * scale + shift + sc
    else:
        def kernel(y2_ref, xsc_ref, s2_ref, q2_ref, g2_ref, be2_ref, out_ref):
            scale, shift = _bn_affine(s2_ref, q2_ref, g2_ref, be2_ref, inv_m)
            out_ref[...] = y2_ref[...] * scale + shift + xsc_ref[...]
    return kernel


# ------------------------------- wrapper -------------------------------------
def _images_per_block(N, HoWo, block_lanes):
    # g images per block: g | N and g*HoWo a multiple of 128 (lane density);
    # g == N (block == full M) is always legal.  Largest g that fits the lane
    # budget, else the smallest legal one.
    valid = [g for g in range(1, N + 1) if N % g == 0 and (g * HoWo) % 128 == 0]
    if not valid:
        valid = [N]
    fits = [g for g in valid if g * HoWo <= block_lanes]
    return max(fits) if fits else min(valid)


def resblock_down(x_nhwc, params, *, downsample, mxu_dtype=jnp.bfloat16,
                  block_lanes=2048, fuse_taps_below=32):
    """Pallas forward pass. x_nhwc: (N,H,W,Cin) f32 -> (N,Ho,Wo,Cout) f32."""
    N, H, W, Cin = x_nhwc.shape
    Cout = params["w1"].shape[-1]
    stride = 2 if downsample else 1
    has_sc_conv = downsample or (Cin != Cout)
    Ho = (H - 1) // stride + 1
    Wo = (W - 1) // stride + 1
    HoWo = Ho * Wo
    M = N * HoWo
    inv_m = 1.0 / float(M)

    g_imgs = _images_per_block(N, HoWo, block_lanes)
    TM = g_imgs * HoWo
    nblk = M // TM
    assert TM % HoWo == 0 and nblk * TM == M   # image-aligned blocks (roll invariant)

    f32 = jnp.float32

    # ---- wrapper-side layout plumbing (no FLOPs) ----------------------------
    # Boundary masks over the conv output grid, (4, M) f32 in {0,1}.
    ii = jnp.repeat(jnp.arange(Ho), Wo)
    jj = jnp.tile(jnp.arange(Wo), Ho)
    per_img = jnp.stack([ii >= 1, ii <= Ho - 2, jj >= 1, jj <= Wo - 2]).astype(f32)
    masks = jnp.tile(per_img, (1, N))                                  # (4, M)

    if downsample:
        # Stride-2 conv1: wrapper im2col patch slab (9*Cin, M).
        xp = jnp.pad(x_nhwc, ((0, 0), (1, 1), (1, 1), (0, 0)))
        cols = []
        for ky in range(3):
            for kx in range(3):
                win = xp[:, ky:ky + (Ho - 1) * stride + 1:stride,
                            kx:kx + (Wo - 1) * stride + 1:stride, :]
                cols.append(win.reshape(M, Cin))
        conv1_in = jnp.concatenate(cols, axis=-1).T                    # (9*Cin, M)
        c1_rows = 9 * Cin
    else:
        conv1_in = x_nhwc.reshape(M, Cin).T                            # (Cin, M)
        c1_rows = Cin

    x_sc = x_nhwc[:, ::2, ::2, :] if downsample else x_nhwc
    xsc = x_sc.reshape(M, Cin).T                                       # (Cin, M)

    w1 = params["w1"].reshape(9 * Cin, Cout).T.astype(mxu_dtype)       # (Cout, 9Cin)
    w2 = params["w2"].reshape(9 * Cout, Cout).T.astype(mxu_dtype)      # (Cout, 9Cout)
    g1 = params["g1"].reshape(Cout, 1).astype(f32)
    be1 = params["be1"].reshape(Cout, 1).astype(f32)
    g2 = params["g2"].reshape(Cout, 1).astype(f32)
    be2 = params["be2"].reshape(Cout, 1).astype(f32)

    def col_spec(rows):
        return pl.BlockSpec((rows, TM), lambda i: (0, i))

    def full_spec(shape):
        return pl.BlockSpec(shape, lambda i: (0, 0))

    stats_shape = jax.ShapeDtypeStruct((Cout, 1), f32)
    stats_spec = full_spec((Cout, 1))

    # ---- K1: y1 = conv1(relu(x)), accumulate sum/sumsq(y1) ------------------
    if downsample:
        ins1 = [conv1_in, w1]
        specs1 = [col_spec(c1_rows), full_spec((Cout, 9 * Cin))]
    else:
        ins1 = [conv1_in, masks, w1]
        specs1 = [col_spec(c1_rows), col_spec(4), full_spec((Cout, 9 * Cin))]

    y1, s1, q1 = pl.pallas_call(
        _make_k1(downsample, Wo, fuse_taps_below, mxu_dtype),
        grid=(nblk,),
        in_specs=specs1,
        out_specs=(col_spec(Cout), stats_spec, stats_spec),
        out_shape=(jax.ShapeDtypeStruct((Cout, M), f32), stats_shape, stats_shape),
        compiler_params=pltpu.CompilerParams(
            dimension_semantics=("arbitrary",), vmem_limit_bytes=VMEM_LIMIT),
        cost_estimate=pl.CostEstimate(
            flops=int(2 * M * Cout * 9 * Cin), transcendentals=0,
            bytes_accessed=int((c1_rows + Cout + 4) * M * 4)),
    )(*ins1)

    # ---- K2: r1 = relu(BN1(y1)); y2 = conv2(r1); accumulate stats(y2) -------
    y2, s2, q2 = pl.pallas_call(
        _make_k2(Wo, inv_m, fuse_taps_below, mxu_dtype),
        grid=(nblk,),
        in_specs=[col_spec(Cout), col_spec(4), full_spec((Cout, 9 * Cout)),
                  stats_spec, stats_spec, stats_spec, stats_spec],
        out_specs=(col_spec(Cout), stats_spec, stats_spec),
        out_shape=(jax.ShapeDtypeStruct((Cout, M), f32), stats_shape, stats_shape),
        compiler_params=pltpu.CompilerParams(
            dimension_semantics=("arbitrary",), vmem_limit_bytes=VMEM_LIMIT),
        cost_estimate=pl.CostEstimate(
            flops=int(2 * M * Cout * 9 * Cout), transcendentals=int(nblk * Cout),
            bytes_accessed=int((2 * Cout + 4) * M * 4)),
    )(y1, masks, w2, s1, q1, g1, be1)

    # ---- K3: out = BN2(y2) + shortcut(x) ------------------------------------
    ins3 = [y2, xsc, s2, q2, g2, be2]
    specs3 = [col_spec(Cout), col_spec(Cin), stats_spec, stats_spec,
              stats_spec, stats_spec]
    sc_flops = 2 * M * Cout * Cin if has_sc_conv else 0
    if has_sc_conv:
        ins3 += [params["ws"].T.astype(mxu_dtype), params["bs"].reshape(Cout, 1).astype(f32)]
        specs3 += [full_spec((Cout, Cin)), stats_spec]

    out2d = pl.pallas_call(
        _make_k3(has_sc_conv, inv_m, mxu_dtype),
        grid=(nblk,),
        in_specs=specs3,
        out_specs=col_spec(Cout),
        out_shape=jax.ShapeDtypeStruct((Cout, M), f32),
        compiler_params=pltpu.CompilerParams(
            dimension_semantics=("parallel",), vmem_limit_bytes=VMEM_LIMIT),
        cost_estimate=pl.CostEstimate(
            flops=int(sc_flops + 3 * M * Cout), transcendentals=int(nblk * Cout),
            bytes_accessed=int((2 * Cout + Cin) * M * 4)),
    )(*ins3)

    # (Cout, M) lane-dense slab -> NHWC (only needed at the block boundary;
    # chained ResBlocks would consume the slab directly).
    return jnp.transpose(out2d.reshape(Cout, N, Ho, Wo), (1, 2, 3, 0))


# ---------------- pure-JAX reference (for verification only) -----------------
def resblock_down_ref(x_nhwc, params, *, downsample):
    s = (2, 2) if downsample else (1, 1)
    Cin = x_nhwc.shape[-1]
    Cout = params["w1"].shape[-1]

    def conv(x, w, b, strides, pad):
        y = lax.conv_general_dilated(x, w, window_strides=strides, padding=pad,
                                     dimension_numbers=("NHWC", "HWIO", "NHWC"))
        return y + b.reshape(1, 1, 1, -1)

    def bn(y, g, be):
        m = jnp.mean(y, axis=(0, 1, 2), keepdims=True)
        v = jnp.mean(jnp.square(y - m), axis=(0, 1, 2), keepdims=True)
        return (y - m) * lax.rsqrt(v + EPS) * g.reshape(1, 1, 1, -1) + be.reshape(1, 1, 1, -1)

    r = jnp.maximum(x_nhwc, 0.0)
    r = bn(conv(r, params["w1"], params["b1"], s, [(1, 1), (1, 1)]),
           params["g1"], params["be1"])
    r = jnp.maximum(r, 0.0)
    r = bn(conv(r, params["w2"], params["b2"], (1, 1), [(1, 1), (1, 1)]),
           params["g2"], params["be2"])
    if downsample or Cin != Cout:
        sc = conv(x_nhwc, params["ws"].reshape(1, 1, Cin, Cout), params["bs"],
                  s, [(0, 0), (0, 0)])
    else:
        sc = x_nhwc
    return r + sc


def init_params(key, Cin, Cout, downsample):
    ks = jax.random.split(key, 10)
    p = {
        "w1": 0.1 * jax.random.normal(ks[0], (3, 3, Cin, Cout), jnp.float32),
        "b1": 0.1 * jax.random.normal(ks[1], (1, Cout), jnp.float32),
        "g1": 1.0 + 0.1 * jax.random.normal(ks[2], (1, Cout), jnp.float32),
        "be1": 0.1 * jax.random.normal(ks[3], (1, Cout), jnp.float32),
        "w2": 0.1 * jax.random.normal(ks[4], (3, 3, Cout, Cout), jnp.float32),
        "b2": 0.1 * jax.random.normal(ks[5], (1, Cout), jnp.float32),
        "g2": 1.0 + 0.1 * jax.random.normal(ks[6], (1, Cout), jnp.float32),
        "be2": 0.1 * jax.random.normal(ks[7], (1, Cout), jnp.float32),
    }
    if downsample or Cin != Cout:
        p["ws"] = 0.1 * jax.random.normal(ks[8], (Cin, Cout), jnp.float32)
        p["bs"] = 0.1 * jax.random.normal(ks[9], (1, Cout), jnp.float32)
    return p


if __name__ == "__main__":
    key = jax.random.PRNGKey(0)
    k_x, k_p1, k_p2 = jax.random.split(key, 3)

    # PyTorch-style NCHW input: (batch=4, in_features=4, H=16, W=16).
    # block_lanes=128 keeps the toy grids multi-step so the pipelined path and
    # the BN accumulators are actually exercised.
    N = 4
    x_nchw = jax.random.normal(k_x, (N, 4, 16, 16), jnp.float32)
    x_nhwc = jnp.transpose(x_nchw, (0, 2, 3, 1))

    # Config 1: ResBlockDown(4, 8, downsample=True): stride-2 convs + 1x1 conv shortcut.
    p1 = init_params(k_p1, 4, 8, True)
    ref1 = resblock_down_ref(x_nhwc, p1, downsample=True)
    # f32 MXU: algorithmic exactness check (tight tolerance).
    out1 = resblock_down(x_nhwc, p1, downsample=True,
                         mxu_dtype=jnp.float32, block_lanes=128)
    jax.block_until_ready(out1)
    assert out1.shape == (N, 8, 8, 8)
    assert float(jnp.max(jnp.abs(out1 - ref1))) < 2e-3
    # bf16 MXU operands (default / production path): looser tolerance.
    out1b = resblock_down(x_nhwc, p1, downsample=True, block_lanes=128)
    jax.block_until_ready(out1b)
    assert float(jnp.max(jnp.abs(out1b - ref1))) < 1.5e-1

    # Config 2: ResBlockDown(4, 4, downsample=False): stride-1 convs + identity shortcut.
    p2 = init_params(k_p2, 4, 4, False)
    ref2 = resblock_down_ref(x_nhwc, p2, downsample=False)
    # Force the per-tap accumulation path (production form) in exact f32.
    out2 = resblock_down(x_nhwc, p2, downsample=False,
                         mxu_dtype=jnp.float32, block_lanes=128, fuse_taps_below=0)
    jax.block_until_ready(out2)
    assert out2.shape == (N, 16, 16, 4)
    assert float(jnp.max(jnp.abs(out2 - ref2))) < 2e-3
    # Default bf16 + fused-tiny-K path.
    out2b = resblock_down(x_nhwc, p2, downsample=False, block_lanes=128)
    jax.block_until_ready(out2b)
    assert float(jnp.max(jnp.abs(out2b - ref2))) < 1.5e-1

    print("KERNEL_OK")
</pallas_src>

<mosaic_0001>
module attributes {stable_mosaic.version = 11 : i64} {
  func.func @kernel(%arg0: i32, %arg1: memref<36x128xf32, #tpu.memory_space<vmem>>, %arg2: memref<8x36xf32, #tpu.memory_space<vmem>>, %arg3: memref<8x128xf32, #tpu.memory_space<vmem>>, %arg4: memref<8x1xf32, #tpu.memory_space<vmem>>, %arg5: memref<8x1xf32, #tpu.memory_space<vmem>>) attributes {dimension_semantics = [#tpu.dimension_semantics<arbitrary>], iteration_bounds = array<i64: 2>, scalar_prefetch = 0 : i64, scratch_operands = 0 : i64, tpu.core_type = #tpu.core_type<tc>, window_params = [{transform_indices = @transform_0, window_bounds = array<i64: 36, 128>}, {pipeline_mode = #tpu.pipeline_mode<synchronous>, transform_indices = @transform_1, window_bounds = array<i64: 8, 36>}, {transform_indices = @transform_2, window_bounds = array<i64: 8, 128>}, {pipeline_mode = #tpu.pipeline_mode<synchronous>, transform_indices = @transform_3, window_bounds = array<i64: 8, 1>}, {pipeline_mode = #tpu.pipeline_mode<synchronous>, transform_indices = @transform_4, window_bounds = array<i64: 8, 1>}]} {
    %c0_i32 = arith.constant 0 : i32
    %0 = arith.cmpi eq, %arg0, %c0_i32 : i32
    %1 = arith.extui %0 : i1 to i32
    %c0_i32_0 = arith.constant 0 : i32
    %2 = arith.cmpi ne, %1, %c0_i32_0 : i32
    scf.if %2 {
      %cst_17 = arith.constant 0.000000e+00 : f32
      %20 = vector.broadcast %cst_17 : f32 to vector<8x1xf32>
      %c0_18 = arith.constant 0 : index
      %c0_19 = arith.constant 0 : index
      %21 = vector.load %arg4[%c0_18, %c0_19] : memref<8x1xf32, #tpu.memory_space<vmem>>, vector<8x1xf32>
      tpu.vector_store %arg4[%c0_18, %c0_19], %20 {strides = array<i32>} : memref<8x1xf32, #tpu.memory_space<vmem>>, vector<8x1xf32>,
      %cst_20 = arith.constant 0.000000e+00 : f32
      %22 = vector.broadcast %cst_20 : f32 to vector<8x1xf32>
      %c0_21 = arith.constant 0 : index
      %c0_22 = arith.constant 0 : index
      %23 = vector.load %arg5[%c0_21, %c0_22] : memref<8x1xf32, #tpu.memory_space<vmem>>, vector<8x1xf32>
      tpu.vector_store %arg5[%c0_21, %c0_22], %22 {strides = array<i32>} : memref<8x1xf32, #tpu.memory_space<vmem>>, vector<8x1xf32>,
    } else {
    }
    %c0 = arith.constant 0 : index
    %c0_1 = arith.constant 0 : index
    %3 = vector.load %arg1[%c0, %c0_1] : memref<36x128xf32, #tpu.memory_space<vmem>>, vector<36x128xf32>
    %cst = arith.constant 0.000000e+00 : f32
    %4 = vector.broadcast %cst : f32 to vector<36x128xf32>
    %5 = arith.maximumf %3, %4 : vector<36x128xf32>
    %c0_2 = arith.constant 0 : index
    %c0_3 = arith.constant 0 : index
    %6 = vector.load %arg2[%c0_2, %c0_3] : memref<8x36xf32, #tpu.memory_space<vmem>>, vector<8x36xf32>
    %cst_4 = arith.constant dense<0.000000e+00> : vector<8x128xf32>
    %7 = tpu.matmul %6, %5, %cst_4 {dimension_numbers = #tpu.dot_dimension_numbers<[1], [0], [0], [1], [0, 0, 1, 1], [], []>} : vector<8x36xf32>, vector<36x128xf32>, vector<8x128xf32> -> vector<8x128xf32>
    %c0_5 = arith.constant 0 : index
    %c0_6 = arith.constant 0 : index
    %8 = vector.load %arg3[%c0_5, %c0_6] : memref<8x128xf32, #tpu.memory_space<vmem>>, vector<8x128xf32>
    tpu.vector_store %arg3[%c0_5, %c0_6], %7 {strides = array<i32>} : memref<8x128xf32, #tpu.memory_space<vmem>>, vector<8x128xf32>,
    %c0_7 = arith.constant 0 : index
    %c0_8 = arith.constant 0 : index
    %9 = vector.load %arg4[%c0_7, %c0_8] : memref<8x1xf32, #tpu.memory_space<vmem>>, vector<8x1xf32>
    %cst_9 = arith.constant dense<0.000000e+00> : vector<8xf32>
    %10 = vector.multi_reduction <add>, %7, %cst_9 [1] : vector<8x128xf32> to vector<8xf32>
    %11 = vector.shape_cast %10 : vector<8xf32> to vector<8x1xf32>
    %12 = arith.addf %9, %11 : vector<8x1xf32>
    %c0_10 = arith.constant 0 : index
    %c0_11 = arith.constant 0 : index
    %13 = vector.load %arg4[%c0_10, %c0_11] : memref<8x1xf32, #tpu.memory_space<vmem>>, vector<8x1xf32>
    tpu.vector_store %arg4[%c0_10, %c0_11], %12 {strides = array<i32>} : memref<8x1xf32, #tpu.memory_space<vmem>>, vector<8x1xf32>,
    %c0_12 = arith.constant 0 : index
    %c0_13 = arith.constant 0 : index
    %14 = vector.load %arg5[%c0_12, %c0_13] : memref<8x1xf32, #tpu.memory_space<vmem>>, vector<8x1xf32>
    %15 = arith.mulf %7, %7 : vector<8x128xf32>
    %cst_14 = arith.constant dense<0.000000e+00> : vector<8xf32>
    %16 = vector.multi_reduction <add>, %15, %cst_14 [1] : vector<8x128xf32> to vector<8xf32>
    %17 = vector.shape_cast %16 : vector<8xf32> to vector<8x1xf32>
    %18 = arith.addf %14, %17 : vector<8x1xf32>
    %c0_15 = arith.constant 0 : index
    %c0_16 = arith.constant 0 : index
    %19 = vector.load %arg5[%c0_15, %c0_16] : memref<8x1xf32, #tpu.memory_space<vmem>>, vector<8x1xf32>
    tpu.vector_store %arg5[%c0_15, %c0_16], %18 {strides = array<i32>} : memref<8x1xf32, #tpu.memory_space<vmem>>, vector<8x1xf32>,
    return
  }
  func.func @transform_0(%arg0: i32) -> (i32, i32) {
    %c0_i32 = arith.constant 0 : i32
    %c0_i32_0 = arith.constant 0 : i32
    return %c0_i32, %arg0 : i32, i32
  }
  func.func @transform_1(%arg0: i32) -> (i32, i32) {
    %c0_i32 = arith.constant 0 : i32
    %c0_i32_0 = arith.constant 0 : i32
    %c0_i32_1 = arith.constant 0 : i32
    return %c0_i32, %c0_i32_0 : i32, i32
  }
  func.func @transform_2(%arg0: i32) -> (i32, i32) {
    %c0_i32 = arith.constant 0 : i32
    %c0_i32_0 = arith.constant 0 : i32
    return %c0_i32, %arg0 : i32, i32
  }
  func.func @transform_3(%arg0: i32) -> (i32, i32) {
    %c0_i32 = arith.constant 0 : i32
    %c0_i32_0 = arith.constant 0 : i32
    %c0_i32_1 = arith.constant 0 : i32
    return %c0_i32, %c0_i32_0 : i32, i32
  }
  func.func @transform_4(%arg0: i32) -> (i32, i32) {
    %c0_i32 = arith.constant 0 : i32
    %c0_i32_0 = arith.constant 0 : i32
    %c0_i32_1 = arith.constant 0 : i32
    return %c0_i32, %c0_i32_0 : i32, i32
  }
}

</mosaic_0001>

<bundles_post_ra>
// kernel: tpu_custom_call.1
= control target key start
LH: loop header
LB: loop body
LE: loop exit
PB: predicated region body
PF: predicated region fallthrough
CT: control target
= control target key end

     0   :  { %10 = vsyncpa [#allocation3], 0  ;;  %s888_s0 = inlined_call_operand.hbm [shape: f32[36,256], index: 0, kind: input, shape index: {}]   ;;  %s889_s1 = inlined_call_operand.hbm [shape: f32[8,36], index: 1, kind: input, shape index: {}]   ;;  %s890_s2 = inlined_call_operand.hbm [shape: f32[8,256], index: 2, kind: output, shape index: {0}]   ;;  %s891_s3 = inlined_call_operand.vmem [shape: f32[8,1], index: 3, kind: output, shape index: {1}]   ;;  %s892_s4 = inlined_call_operand.vmem [shape: f32[8,1], index: 4, kind: output, shape index: {2}]  }
   0x1   :  { %12 = vsyncpa [#allocation3 + $0x1], 0 }
   0x2   :  { %13 = vsyncpa [#allocation6], 0 }
   0x3   :  { %14 = vsyncpa [#allocation4], 0 }
   0x4   :  { %16 = vsyncpa [#allocation4 + $0x1], 0  ;;  %s695_s15 = smov 0   ;;  %s697_s16 = smov 0  }
   0x5   :  { %s699_s17 = smov 0   ;;  %s701_s18 = smov 0  }
   0x6 LB: > { %s716_s19 = sadd.s32 4294967295, %s659_s18   ;;  %s438_s20 = sadd.s32 4294967294, %s659_s18   ;;  %s659_s18 = sphi %s701_s18, %s916_s18   ;;  %s655_s17 = sphi %s699_s17, %s915_s17   ;;  %s651_s16 = sphi %s697_s16, %s914_s16   ;;  %s647_s15 = sphi %s695_s15, %s913_s15  }
   0x7   : > { %s720_s21 = sadd.s32 1, %s659_s18   ;;  %s29_s22 = sadd.s32 1, %s655_s17 }
   0x8   : > { %s26_s23 = ssub.s32 %s659_s18, %s720_s21  ;;  %p36_p0 = scmp.ne.s32.totalorder %s655_s17, %s651_s16 }
   0x9   : > { %p27_p1 = scmp.eq.s32.totalorder %s26_s23, 0  ;;  %p37_p2 = scmp.eq.s32.totalorder %s659_s18, 0 }
   0xa   : > { %p42_p3 = scmp.ne.s32.totalorder %s651_s16, %s647_s15  ;;  %p893_p4 = scmp.eq.s32.totalorder %s716_s19, 0 }
   0xb   : > { %s732_s24 = scalar_select %p27_p1, %s655_s17, %s29_s22  }
   0xc   : > { %p734_p5 = por %p37_p2, %p36_p0  ;;  %p740_p6 = por %p893_p4, %p42_p3 }
   0xd   : > { %p87_p7 = scmp.eq.s32.totalorder %s716_s19, 1  ;;  %p93_p8 = scmp.eq.s32.totalorder %s438_s20, 1 }
   0xe   : > { %s898_s26 = scalar_select %p740_p6, 1, 0 }
   0xf   : > { %p439_p9 = scmp.ge.s32.totalorder %s659_s18, 1  ;;  %p142_p10 = scmp.lt.s32.totalorder %s659_s18, 3 }
  0x10   : > { %p747_p11 = por %p87_p7, %p36_p0  ;;  %p751_p12 = por %p93_p8, %p42_p3 }
  0x11   : > { %p755_p13 = pnand %p439_p9, %p142_p10  ;;  %s661_s30 = smov [#allocation5]  }
  0x12   : > { %s899_s27 = scalar_select %p747_p11, 1, 0 }
  0x13   : > { %s900_s28 = scalar_select %p751_p12, 1, 0 }
  0x14   : > { %s901_s29 = scalar_select %p755_p13, 1, 0 }
  0x15   : > { %p482_p4 = pneg %p755_p13  ;;  %s155_s5 = sshll.u32 %s661_s30, 4  ;;  %s156_s5 = int_to_ptr.vmem [resolvable:$true] %s155_s5 }
  0x16   : > { %p495_p0 = scmp.lt.s32.totalorder %s659_s18, 2  ;;  %p902_p7 = scmp.eq.s32.totalorder %s716_s19, 0 }
  0x17   : > { %s166_s7 = sand.u32 1, %s655_s17   ;;  %s548_s10 = scalar_lea.vmem %s156_s5, 128 }
  0x18   : > { %p766_p6 = pnand %p482_p4, %p902_p7  ;;  %p773_p3 = pnand %p495_p0, %p734_p5 }
  0x19   : > { %s472_s9 = smul.u32 40, %s166_s7  ;;  %p549_p9 = scmp.ne.s32.totalorder %s156_s5, %s548_s10 }
  0x1a   : > { %p539_p8 = pneg %p766_p6  ;;  %p556_p1 = scmp.lt.s32.totalorder %s156_s5, %s156_s5 }
  0x1b   : > { %p557_p12 = scmp.lt.s32.totalorder %s548_s10, %s548_s10 }
  0x1c   : > { %p551_p10 = pnand %p549_p9, %p539_p8 }
  0x1d   : > { %p558_p4 = por %p557_p12, %p556_p1 }
  0x1e   : > { %p552_p2 = pneg %p551_p10 }
  0x20   : > { %p559_p7 = pnand %p558_p4, %p552_p2 }
  0x22   : > { %562 = shalt.err (!%p559_p7)
}
  0x23   : > { %485 = dma.hbm_to_vmem [thread:$0]  (!%p766_p6), %s889_s1, 128, %s156_s5, [#allocation6]  }
  0x24   : > { %s442_s13 = sshll.u32 %s659_s18, 7  ;;  %s170_s14 = scalar_lea.vmem [#allocation2], %s472_s9 }
  0x25   : > { %s176_s20 = sshll.u32 %s170_s14, 4  ;;  %s788_s25 = scalar_lea.hbm %s888_s0, %s442_s13  ;;  %s790_s20 = int_to_ptr.vmem [resolvable:$true] %s176_s20 }
  0x26   : > { %s792_s30 = scalar_lea.sflag [#allocation3], %s166_s7  ;;  %s563_s6 = scalar_lea.hbm %s788_s25, 640 }
  0x27   : > { %p564_p5 = scmp.ne.s32.totalorder %s788_s25, %s563_s6  ;;  %p565_p12 = pneg %p773_p3 }
  0x28   : > { %s568_s10 = scalar_lea.hbm %s888_s0, 1280  ;;  %p569_p2 = scmp.lt.s32.totalorder %s788_s25, %s888_s0 }
  0x29   : > { %p566_p6 = pnand %p565_p12, %p564_p5  ;;  %p570_p0 = scmp.lt.s32.totalorder %s568_s10, %s563_s6 }
  0x2b   : > { %p567_p1 = pneg %p566_p6  ;;  %p571_p8 = por %p570_p0, %p569_p2 }
  0x2d   : > { %p572_p9 = pnand %p571_p8, %p567_p1 }
  0x2f   : > { %575 = shalt.err (!%p572_p9)
}
  0x30   : > { %s576_s7 = scalar_lea.vmem %s790_s20, 640  ;;  %s662_s13 = smov [#allocation2]  }
  0x31   : > { %p577_p10 = scmp.ne.s32.totalorder %s790_s20, %s576_s7  ;;  %s581_s14 = sshll.u32 %s662_s13, 4  ;;  %s582_s14 = int_to_ptr.vmem [resolvable:$false] %s581_s14 }
  0x32   : > { %s583_s22 = scalar_lea.vmem %s582_s14, 1280  ;;  %p584_p5 = scmp.lt.s32.totalorder %s790_s20, %s582_s14 }
  0x33   : > { %p579_p4 = pnand %p577_p10, %p565_p12  ;;  %p585_p6 = scmp.lt.s32.totalorder %s583_s22, %s576_s7 }
  0x35   : > { %p580_p7 = pneg %p579_p4  ;;  %p586_p11 = por %p585_p6, %p584_p5 }
  0x37   : > { %p587_p13 = pnand %p586_p11, %p580_p7 }
  0x39   : > { %590 = shalt.err (!%p587_p13)
}
  0x3a   : > { %s663_s23 = smov 256   ;;  %s664_s6 = smov 128  }
  0x3b   : > { %s665_s5 = smov 8   ;;  %p905_p12 = scmp.ne.s32.totalorder %s901_s29, 0 }
  0x3c   : > { %489 = dma.hbm_to_vmem [thread:$0]  (!%p773_p3), %s788_s25, 640, %s790_s20, %s792_s30, %s663_s23, %s664_s6, %s665_s5  }
  0x3d   : > { %188 = sbr.rel (%p905_p12) target bundleno = 429 (0x1ad), region = 28  ;;  %s816_s9 = sand.u32 (!%p905_p12), 1, %s651_s16  }
  0x3e   : > { %s473_s10 = smul.u32 (!%p905_p12), 40, %s816_s9  ;;  %s191_s11 = scalar_lea.sflag (!%p905_p12), [#allocation3], %s816_s9 }
  0x3f   : > { %p906_p11 = scmp.ne.s32.totalorder (!%p905_p12), %s898_s26, 0 }
  0x40   : > { %s194_s12 = scalar_lea.vmem (!%p905_p12), [#allocation2], %s473_s10 }
  0x42   : > { %634 = dma.done.wait (%p906_p11), %s191_s11, 640  }
  0x43   : > { %636 = vsyncadd (%p906_p11), %s191_s11, 4294966656  ;;  %p907_p13 = scmp.eq.s32.totalorder %s716_s19, 0 }
  0x45   : > { %638 = dma.done.wait (%p907_p13), [#allocation6], 128   ;;  %p908_p3 = pmov %p907_p13 }
  0x46   : > { %s445_s29 = sshll.u32 %s816_s9, 3  ;;  %p909_p1 = scmp.ne.s32.totalorder %s716_s19, 0 }
  0x47   : > { %640 = vsyncadd (%p908_p3), [#allocation6], 4294967168  ;;  %s829_s8 = scalar_lea.vmem [#allocation7], %s445_s29 }
  0x48   : > { %226 = sbr.rel (%p909_p1) target bundleno = 79 (0x4f), region = 40 }
  0x4d   : > { %vm227_vm0 = vcmask 7168   ;;  %v666_v0 = vmov 0.0  }
  0x4e   : > { %228 = vst.msk [vmem:[%s891_s3] sm:$0xff] %vm227_vm0, %v666_v0  ;;  %229 = vst.msk [vmem:[%s892_s4] sm:$0xff] %vm227_vm0, %v666_v0 }
  0x4f PF: > { %v234_v1 = vld [vmem:[%s194_s12 + $0x20] sm:$0xf]  ;;  %vm245_vm1 = vcmask 1043456   ;;  %v233_v2 = vld [vmem:[%s194_s12 + $0x18] sm:$0xff]  ;;  %v232_v3 = vld [vmem:[%s194_s12 + $0x10] sm:$0xff]  ;;  %v667_v4 = vmov 0.0  }
  0x50   : > { %459 = vmatprep.subr.mxu0 %v667_v4  ;;  %v239_v5 = vmax.f32 %v234_v1, 0.0  ;;  %v238_v6 = vmax.f32 %v233_v2, 0.0  ;;  %v231_v7 = vld [vmem:[%s194_s12 + $0x8] sm:$0xff]  ;;  %vm668_vm2 = vmmov 0   ;;  %v237_v8 = vmax.f32 %v232_v3, 0.0  ;;  %v230_v9 = vld [vmem:[%s194_s12] sm:$0xff] }
  0x51   : > { %469 = vmatprep.mubr.msk.f32.mxu0 %vm668_vm2, %v667_v4  ;;  %v236_v10 = vmax.f32 %v231_v7, 0.0  ;;  %v235_v11 = vmax.f32 %v230_v9, 0.0  ;;  %v240_v12 = vld [vmem:[#allocation5] sm:$0xff]  ;;  %vm241_vm3 = vcmask 293888   ;;  %s450_s7 = sshll.u32 %s716_s19, 7  ;;  %s346_s13 = sshll.u32 %s829_s8, 4  ;;  %s347_s13 = int_to_ptr.vmem [resolvable:$true] %s346_s13 }
  0x52   : > { %460 = vmatpush3.msk.msra.mxu0 %vm245_vm1, %v239_v5  ;;  %s344_s23 = scalar_lea.hbm %s890_s2, %s450_s7  ;;  %s333_s6 = scalar_lea.sflag [#allocation4], %s816_s9 }
  0x53   : > { %461 = vmatprep.subr.mxu0 %v667_v4  ;;  %s591_s5 = scalar_lea.vmem %s347_s13, 128  ;;  %p910_p0 = scmp.ne.s32.totalorder %s899_s27, 0 }
  0x54   : > { %462 = vmatpush3.msra.mxu0 %v238_v6  ;;  %p592_p2 = scmp.ne.s32.totalorder %s347_s13, %s591_s5  ;;  %s669_s10 = smov [#allocation7]  }
  0x55   : > { %463 = vmatprep.subr.mxu0 %v667_v4  ;;  %s595_s11 = sshll.u32 %s669_s10, 4  ;;  %s596_s11 = int_to_ptr.vmem [resolvable:$false] %s595_s11 }
  0x56   : > { %464 = vmatpush3.msra.mxu0 %v237_v8  ;;  %p593_p8 = pnand %p592_p2, %p910_p0  ;;  %s597_s12 = scalar_lea.vmem %s596_s11, 256 }
  0x57   : > { %465 = vmatprep.subr.mxu0 %v667_v4  ;;  %p598_p10 = scmp.lt.s32.totalorder %s347_s13, %s596_s11  ;;  %p599_p4 = scmp.lt.s32.totalorder %s597_s12, %s591_s5 }
  0x58   : > { %466 = vmatpush3.msra.mxu0 %v236_v10  ;;  %p594_p9 = pneg %p593_p8 }
  0x59   : > { %467 = vmatprep.subr.mxu0 %v667_v4  ;;  %p600_p7 = por %p599_p4, %p598_p10 }
  0x5a   : > { %468 = vmatpush3.msra.mxu0 %v235_v11 }
  0x5b   : > { %470 = vmatmul.mubr.msk.f32.vlgmr.msra.gmra.mxu0 %vm241_vm3, %v240_v12  ;;  %p601_p5 = pnand %p600_p7, %p594_p9 }
 0x11b   : > { %v315_v13 = vpop.f32.mrf.mxu0 }
 0x11c   : > { %319 = vst [vmem:[%s829_s8] sm:$0xff] %v315_v13  ;;  %321 = vadd.xlane.f32.xlu0 %v315_v13  ;;  %v327_v15 = vmul.f32 %v315_v13, %v315_v13 }
 0x11d   : > { %v471_v14 = vpop.f32.mrf.mxu0 }
 0x120   : > { %328 = vadd.xlane.f32.xlu0 %v327_v15 }
 0x121   : > { %604 = shalt.err (!%p601_p5)
}
 0x122   : > { %s605_s19 = scalar_lea.hbm %s344_s23, 128  ;;  %s609_s8 = scalar_lea.hbm %s890_s2, 256 }
 0x123   : > { %p606_p6 = scmp.ne.s32.totalorder %s344_s23, %s605_s19  ;;  %p610_p13 = scmp.lt.s32.totalorder %s344_s23, %s890_s2 }
 0x124   : > { %p611_p3 = scmp.lt.s32.totalorder %s609_s8, %s605_s19 }
 0x125   : > { %p607_p12 = pnand %p606_p6, %p910_p0 }
 0x126   : > { %p612_p1 = por %p611_p3, %p610_p13 }
 0x127   : > { %p608_p11 = pneg %p607_p12 }
 0x129   : > { %p613_p2 = pnand %p612_p1, %p608_p11 }
 0x12b   : > { %616 = shalt.err (!%p613_p2)
}
 0x12c   : > { %480 = dma.vmem_to_hbm [thread:$0]  (%p910_p0), %s347_s13, 128, %s344_s23, %s333_s6   ;;  %v320_v16 = vld [vmem:[%s891_s3] sm:$0xff]  ;;  %vm324_vm4 = vcmask 7168  }
 0x12d   : > { %v326_v19 = vld [vmem:[%s892_s4] sm:$0xff] }
 0x1a5   : > { %v322_v17 = vpop.xlane.xlu0 %321 }
 0x1a6   : > { %v323_v18 = vadd.f32 %v322_v17, %v320_v16 }
 0x1a8   : > { %325 = vst.msk [vmem:[%s891_s3] sm:$0xff] %vm324_vm4, %v323_v18 }
 0x1a9   : > { %v329_v20 = vpop.xlane.xlu0 %328 }
 0x1aa   : > { %v330_v21 = vadd.f32 %v329_v20, %v326_v19 }
 0x1ac   : > { %331 = vst.msk [vmem:[%s892_s4] sm:$0xff] %vm324_vm4, %v330_v21 }
 0x1ad PF: > { %s370_s13 = sand.u32 1, %s647_s15   ;;  %p911_p0 = scmp.ne.s32.totalorder %s900_s28, 0 }
 0x1ae   : > { %p912_p8 = scmp.ge.s32.totalorder %s659_s18, 2  ;;  %s371_s23 = scalar_lea.sflag [#allocation4], %s370_s13 }
 0x1b0   : > { %p491_p9 = pnand %p912_p8, %p911_p0 }
 0x1b2   : > { %p492_p10 = pneg %p491_p9 }
 0x1b4   : > { %642 = dma.done.wait (%p492_p10), %s371_s23, 128  }
 0x1b5   : > { %644 = vsyncadd (%p492_p10), %s371_s23, 4294967168  ;;  %p19_p4 = scmp.ge.s32.totalorder %s720_s21, 4   ;;  %s913_s15 = smov %s651_s16 }
 0x1b6   : > { %s914_s16 = smov %s655_s17  ;;  %s915_s17 = smov %s732_s24 }
 0x1b7   : > { %s916_s18 = smov %s720_s21  ;;  %21 = sbr.rel (!%p19_p4) target bundleno = 6 (0x6), region = 97 }
 0x1bc   :  { %376 = vsyncpa [#allocation3], 1 }
 0x1bd   :  { %378 = vsyncpa [#allocation3 + $0x1], 1 }
 0x1be   :  { %379 = vsyncpa [#allocation6], 1 }
 0x1bf   :  { %380 = vsyncpa [#allocation4], 1 }
 0x1c0   :  { %382 = vsyncpa [#allocation4 + $0x1], 1 }

</bundles_post_ra>
